<compile_context>
chip_gen: v7x
topology: tpu7x:2x2x1
jax: 0.10.0
libtpu: 0.0.40
codegen_flags: <defaults>
</compile_context>

<pallas_src>
import jax
import jax.numpy as jnp
from jax.experimental import pallas as pl
from jax.experimental.pallas import tpu as pltpu

EPS = 1e-5


def prenorm_kernel(x_ref, wg_ref, bf_ref, o_ref):
    # x_ref: (1, C, TP) block -- channels on sublanes, pixels on lanes.
    x = x_ref[0].astype(jnp.float32)                       # (C, TP)
    C = x.shape[0]

    mean = jnp.mean(x, axis=0, keepdims=True)              # (1, TP)
    xc = x - mean
    var = jnp.mean(xc * xc, axis=0, keepdims=True)         # biased (unbiased=False)
    ynorm = xc * jax.lax.rsqrt(var + EPS)                  # (C, TP)

    wg = wg_ref[...]                                       # (C, C) f32, g folded in
    bf = bf_ref[...]                                       # (C, 1) f32, b folded in

    if C <= 16:
        # 1x1 conv as unrolled VPU FMAs: out = sum_c Wg[:, c] (x) ynorm[c, :]
        acc = wg[:, 0:1] * ynorm[0:1, :]
        for c in range(1, C):
            acc = acc + wg[:, c:c + 1] * ynorm[c:c + 1, :]
        out = acc + bf
    else:
        # Large C: use the MXU.
        out = jnp.dot(wg, ynorm, preferred_element_type=jnp.float32) + bf

    o_ref[0] = out.astype(o_ref.dtype)


def _pick_pixel_tile(num_pixels, bytes_per_pixel, target_block_bytes=2 * 1024 * 1024):
    """Largest multiple of 128 dividing num_pixels, capped by block byte budget.
    Falls back to the full extent (always a legal block shape)."""
    cap = max(128, (target_block_bytes // max(bytes_per_pixel, 1)) // 128 * 128)
    t = min(cap, (num_pixels // 128) * 128)
    while t >= 128:
        if num_pixels % t == 0:
            return t
        t -= 128
    return num_pixels


def prenorm_forward(x_nchw, g, b, conv_w, conv_b):
    """x_nchw: [N, C, H, W]; g,b: [1, C, 1, 1]; conv_w: [C, C]; conv_b: [C]."""
    N, C, H, W = x_nchw.shape
    P = H * W

    # Native-layout view, no data movement.
    x3 = x_nchw.reshape(N, C, P)

    # Fold ChanNorm's affine (g, b) into the 1x1 conv.
    wg = (conv_w * g.reshape(1, C)).astype(jnp.float32)                 # (Cout, Cin)
    bf = (conv_b + conv_w @ b.reshape(C)).reshape(C, 1).astype(jnp.float32)

    tp = _pick_pixel_tile(P, bytes_per_pixel=C * 4)
    grid = (N, P // tp)

    out3 = pl.pallas_call(
        prenorm_kernel,
        out_shape=jax.ShapeDtypeStruct((N, C, P), x_nchw.dtype),
        grid_spec=pltpu.PrefetchScalarGridSpec(
            num_scalar_prefetch=0,
            grid=grid,
            in_specs=[
                pl.BlockSpec((1, C, tp), lambda n, p: (n, 0, p)),  # x block
                pl.BlockSpec((C, C), lambda n, p: (0, 0)),         # folded weight
                pl.BlockSpec((C, 1), lambda n, p: (0, 0)),         # folded bias
            ],
            out_specs=pl.BlockSpec((1, C, tp), lambda n, p: (n, 0, p)),
        ),
        compiler_params=pltpu.CompilerParams(
            dimension_semantics=("parallel", "parallel")),
    )(x3, wg, bf)

    return out3.reshape(N, C, H, W)


def prenorm_reference(x, g, b, conv_w, conv_b):
    """Pure-JAX reference matching the PyTorch module (NCHW)."""
    mean = jnp.mean(x, axis=1, keepdims=True)
    var = jnp.mean((x - mean) ** 2, axis=1, keepdims=True)   # unbiased=False
    y = (x - mean) / jnp.sqrt(var + EPS) * g + b
    out = jnp.einsum("oc,nchw->nohw", conv_w, y) + conv_b[None, :, None, None]
    return out


if __name__ == "__main__":
    N, C, H, W = 2, 4, 16, 16

    key = jax.random.PRNGKey(0)
    kx, kw, kb, kg, kbb = jax.random.split(key, 5)

    x = jax.random.normal(kx, (N, C, H, W), dtype=jnp.float32)

    # ChanNorm params (nontrivial values so the g/b-folding path is exercised).
    g = 1.0 + 0.1 * jax.random.normal(kg, (1, C, 1, 1), dtype=jnp.float32)
    b = 0.1 * jax.random.normal(kbb, (1, C, 1, 1), dtype=jnp.float32)

    # Deterministic synthetic fn = Conv2d(C, C, kernel_size=1)
    conv_w = 0.1 * jax.random.normal(kw, (C, C), dtype=jnp.float32)
    conv_b = 0.1 * jax.random.normal(kb, (C,), dtype=jnp.float32)

    out = prenorm_forward(x, g, b, conv_w, conv_b)
    out = jax.block_until_ready(out)

    ref = prenorm_reference(x, g, b, conv_w, conv_b)
    assert out.shape == (N, C, H, W)
    assert jnp.allclose(out, ref, atol=1e-5, rtol=1e-5), "mismatch vs reference"

    print("KERNEL_OK")
</pallas_src>

<mosaic_0001>
module attributes {stable_mosaic.version = 11 : i64} {
  func.func @prenorm_kernel(%arg0: i32, %arg1: i32, %arg2: memref<1x4x256xf32, #tpu.memory_space<vmem>>, %arg3: memref<4x4xf32, #tpu.memory_space<vmem>>, %arg4: memref<4x1xf32, #tpu.memory_space<vmem>>, %arg5: memref<1x4x256xf32, #tpu.memory_space<vmem>>) attributes {dimension_semantics = [#tpu.dimension_semantics<parallel>, #tpu.dimension_semantics<parallel>], iteration_bounds = array<i64: 2, 1>, scalar_prefetch = 0 : i64, scratch_operands = 0 : i64, tpu.core_type = #tpu.core_type<tc>, window_params = [{transform_indices = @transform_0, window_bounds = array<i64: 1, 4, 256>}, {pipeline_mode = #tpu.pipeline_mode<synchronous>, transform_indices = @transform_1, window_bounds = array<i64: 4, 4>}, {pipeline_mode = #tpu.pipeline_mode<synchronous>, transform_indices = @transform_2, window_bounds = array<i64: 4, 1>}, {transform_indices = @transform_3, window_bounds = array<i64: 1, 4, 256>}]} {
    %c0 = arith.constant 0 : index
    %c0_0 = arith.constant 0 : index
    %c0_1 = arith.constant 0 : index
    %0 = vector.load %arg2[%c0, %c0_0, %c0_1] : memref<1x4x256xf32, #tpu.memory_space<vmem>>, vector<1x4x256xf32>
    %1 = vector.shape_cast %0 : vector<1x4x256xf32> to vector<4x256xf32>
    %cst = arith.constant dense<0.000000e+00> : vector<256xf32>
    %2 = vector.multi_reduction <add>, %1, %cst [0] : vector<4x256xf32> to vector<256xf32>
    %3 = vector.shape_cast %2 : vector<256xf32> to vector<1x256xf32>
    %cst_2 = arith.constant 4.000000e+00 : f32
    %4 = vector.broadcast %cst_2 : f32 to vector<1x256xf32>
    %5 = arith.divf %3, %4 : vector<1x256xf32>
    %6 = vector.broadcast %5 : vector<1x256xf32> to vector<4x256xf32>
    %7 = arith.subf %1, %6 : vector<4x256xf32>
    %8 = arith.mulf %7, %7 : vector<4x256xf32>
    %cst_3 = arith.constant dense<0.000000e+00> : vector<256xf32>
    %9 = vector.multi_reduction <add>, %8, %cst_3 [0] : vector<4x256xf32> to vector<256xf32>
    %10 = vector.shape_cast %9 : vector<256xf32> to vector<1x256xf32>
    %cst_4 = arith.constant 4.000000e+00 : f32
    %11 = vector.broadcast %cst_4 : f32 to vector<1x256xf32>
    %12 = arith.divf %10, %11 : vector<1x256xf32>
    %cst_5 = arith.constant 9.99999974E-6 : f32
    %13 = vector.broadcast %cst_5 : f32 to vector<1x256xf32>
    %14 = arith.addf %12, %13 : vector<1x256xf32>
    %15 = math.rsqrt %14 : vector<1x256xf32>
    %16 = vector.broadcast %15 : vector<1x256xf32> to vector<4x256xf32>
    %17 = arith.mulf %7, %16 : vector<4x256xf32>
    %c0_6 = arith.constant 0 : index
    %c0_7 = arith.constant 0 : index
    %18 = vector.load %arg3[%c0_6, %c0_7] : memref<4x4xf32, #tpu.memory_space<vmem>>, vector<4x4xf32>
    %c0_8 = arith.constant 0 : index
    %c0_9 = arith.constant 0 : index
    %19 = vector.load %arg4[%c0_8, %c0_9] : memref<4x1xf32, #tpu.memory_space<vmem>>, vector<4x1xf32>
    %20 = vector.extract_strided_slice %18 {offsets = [0, 0], sizes = [4, 1], strides = [1, 1]} : vector<4x4xf32> to vector<4x1xf32>
    %21 = vector.extract_strided_slice %17 {offsets = [0, 0], sizes = [1, 256], strides = [1, 1]} : vector<4x256xf32> to vector<1x256xf32>
    %22 = vector.broadcast %20 : vector<4x1xf32> to vector<4x256xf32>
    %23 = vector.broadcast %21 : vector<1x256xf32> to vector<4x256xf32>
    %24 = arith.mulf %22, %23 : vector<4x256xf32>
    %25 = vector.extract_strided_slice %18 {offsets = [0, 1], sizes = [4, 1], strides = [1, 1]} : vector<4x4xf32> to vector<4x1xf32>
    %26 = vector.extract_strided_slice %17 {offsets = [1, 0], sizes = [1, 256], strides = [1, 1]} : vector<4x256xf32> to vector<1x256xf32>
    %27 = vector.broadcast %25 : vector<4x1xf32> to vector<4x256xf32>
    %28 = vector.broadcast %26 : vector<1x256xf32> to vector<4x256xf32>
    %29 = arith.mulf %27, %28 : vector<4x256xf32>
    %30 = arith.addf %24, %29 : vector<4x256xf32>
    %31 = vector.extract_strided_slice %18 {offsets = [0, 2], sizes = [4, 1], strides = [1, 1]} : vector<4x4xf32> to vector<4x1xf32>
    %32 = vector.extract_strided_slice %17 {offsets = [2, 0], sizes = [1, 256], strides = [1, 1]} : vector<4x256xf32> to vector<1x256xf32>
    %33 = vector.broadcast %31 : vector<4x1xf32> to vector<4x256xf32>
    %34 = vector.broadcast %32 : vector<1x256xf32> to vector<4x256xf32>
    %35 = arith.mulf %33, %34 : vector<4x256xf32>
    %36 = arith.addf %30, %35 : vector<4x256xf32>
    %37 = vector.extract_strided_slice %18 {offsets = [0, 3], sizes = [4, 1], strides = [1, 1]} : vector<4x4xf32> to vector<4x1xf32>
    %38 = vector.extract_strided_slice %17 {offsets = [3, 0], sizes = [1, 256], strides = [1, 1]} : vector<4x256xf32> to vector<1x256xf32>
    %39 = vector.broadcast %37 : vector<4x1xf32> to vector<4x256xf32>
    %40 = vector.broadcast %38 : vector<1x256xf32> to vector<4x256xf32>
    %41 = arith.mulf %39, %40 : vector<4x256xf32>
    %42 = arith.addf %36, %41 : vector<4x256xf32>
    %43 = vector.broadcast %19 : vector<4x1xf32> to vector<4x256xf32>
    %44 = arith.addf %42, %43 : vector<4x256xf32>
    %c0_10 = arith.constant 0 : index
    %c0_11 = arith.constant 0 : index
    %c0_12 = arith.constant 0 : index
    %45 = vector.load %arg5[%c0_10, %c0_11, %c0_12] : memref<1x4x256xf32, #tpu.memory_space<vmem>>, vector<1x4x256xf32>
    %46 = vector.shape_cast %45 : vector<1x4x256xf32> to vector<4x256xf32>
    %47 = vector.shape_cast %44 : vector<4x256xf32> to vector<1x4x256xf32>
    tpu.vector_store %arg5[%c0_10, %c0_11, %c0_12], %47 {strides = array<i32>} : memref<1x4x256xf32, #tpu.memory_space<vmem>>, vector<1x4x256xf32>,
    return
  }
  func.func @transform_0(%arg0: i32, %arg1: i32) -> (i32, i32, i32) {
    %c0_i32 = arith.constant 0 : i32
    %c0_i32_0 = arith.constant 0 : i32
    return %arg0, %c0_i32, %arg1 : i32, i32, i32
  }
  func.func @transform_1(%arg0: i32, %arg1: i32) -> (i32, i32) {
    %c0_i32 = arith.constant 0 : i32
    %c0_i32_0 = arith.constant 0 : i32
    %c0_i32_1 = arith.constant 0 : i32
    return %c0_i32, %c0_i32_0 : i32, i32
  }
  func.func @transform_2(%arg0: i32, %arg1: i32) -> (i32, i32) {
    %c0_i32 = arith.constant 0 : i32
    %c0_i32_0 = arith.constant 0 : i32
    %c0_i32_1 = arith.constant 0 : i32
    return %c0_i32, %c0_i32_0 : i32, i32
  }
  func.func @transform_3(%arg0: i32, %arg1: i32) -> (i32, i32, i32) {
    %c0_i32 = arith.constant 0 : i32
    %c0_i32_0 = arith.constant 0 : i32
    return %arg0, %c0_i32, %arg1 : i32, i32, i32
  }
}

</mosaic_0001>

<bundles_post_ra>
// kernel: tpu_custom_call.1
= control target key start
LH: loop header
LB: loop body
LE: loop exit
PB: predicated region body
PF: predicated region fallthrough
CT: control target
= control target key end

     0   :  { %8 = vsyncpa [#allocation3], 0  ;;  %s902_s0 = inlined_call_operand.hbm [shape: f32[2,4,256], index: 0, kind: input, shape index: {}]   ;;  %s903_s1 = inlined_call_operand.vmem [shape: f32[4,4], index: 1, kind: input, shape index: {}]   ;;  %s904_s2 = inlined_call_operand.vmem [shape: f32[4,1], index: 2, kind: input, shape index: {}]   ;;  %s905_s3 = inlined_call_operand.hbm [shape: f32[2,4,256], index: 3, kind: output, shape index: {}]  }
   0x1   :  { %10 = vsyncpa [#allocation3 + $0x1], 0 }
   0x2   :  { %11 = vsyncpa [#allocation4], 0 }
   0x3   :  { %13 = vsyncpa [#allocation4 + $0x1], 0  ;;  %s716_s12 = smov 0   ;;  %s718_s13 = smov 0  }
   0x4   :  { %s720_s14 = smov 0   ;;  %s722_s15 = smov 0  }
   0x5   :  { %s724_s16 = smov 0   ;;  %s726_s17 = smov 0  }
   0x6 LB: > { %s482_s18 = sadd.s32 4294967295, %s688_s17   ;;  %s483_s19 = sadd.s32 4294967294, %s688_s17   ;;  %s688_s17 = sphi %s726_s17, %s19_s17   ;;  %s684_s16 = sphi %s724_s16, %s921_s16   ;;  %s680_s15 = sphi %s722_s15, %s920_s15   ;;  %s676_s14 = sphi %s720_s14, %s919_s14   ;;  %s672_s13 = sphi %s718_s13, %s918_s13   ;;  %s668_s12 = sphi %s716_s12, %s917_s12  }
   0x7   : > { %s31_s20 = sadd.s32 1, %s684_s16  ;;  %s40_s21 = sadd.s32 1, %s676_s14 }
   0x8   : > { %p33_p0 = scmp.ge.s32.totalorder %s31_s20, 2  ;;  %p47_p1 = scmp.ne.s32.totalorder %s676_s14, %s672_s13 }
   0x9   : > { %p48_p2 = scmp.eq.s32.totalorder %s688_s17, 0  ;;  %p53_p3 = scmp.ne.s32.totalorder %s672_s13, %s668_s12 }
   0xa   : > { %s923_s20 = smov (%p33_p0, %s31_s20), 0  ;;  %p54_p5 = scmp.eq.s32.totalorder %s482_s18, 0 }
   0xb   : > { %p757_p4 = por %p48_p2, %p47_p1  ;;  %s35_s23 = ssub.s32 %s684_s16, %s923_s20 }
   0xc   : > { %p121_p6 = scmp.eq.s32.totalorder %s482_s18, 1  ;;  %p38_p7 = scmp.eq.s32.totalorder %s35_s23, 0 }
   0xd   : > { %p763_p8 = por %p54_p5, %p53_p3  ;;  %p127_p10 = scmp.eq.s32.totalorder %s483_s19, 1 }
   0xe   : > { %p767_p9 = por %p121_p6, %p47_p1  ;;  %p511_p13 = scmp.lt.s32.totalorder %s688_s17, 2 }
   0xf   : > { %s772_s26 = scalar_select %p38_p7, %s676_s14, %s40_s21  }
  0x10   : > { %s909_s25 = scalar_select %p767_p9, 1, 0 }
  0x11   : > { %p774_p11 = por %p127_p10, %p53_p3  ;;  %s153_s28 = sand.u32 1, %s676_s14  }
  0x12   : > { %s486_s29 = sshll.u32 %s153_s28, 3  ;;  %s497_s30 = sshll.u32 %s684_s16, 7 }
  0x13   : > { %s910_s27 = scalar_select %p774_p11, 1, 0 }
  0x14   : > { %s785_s6 = scalar_lea.hbm %s902_s0, %s497_s30  ;;  %s157_s7 = scalar_lea.vmem [#allocation2], %s486_s29 }
  0x15   : > { %s167_s8 = sshll.u32 %s157_s7, 4  ;;  %p791_p0 = pnand %p511_p13, %p757_p4  ;;  %s787_s8 = int_to_ptr.vmem [resolvable:$true] %s167_s8 }
  0x16   : > { %s154_s10 = scalar_lea.sflag [#allocation3], %s153_s28  ;;  %s576_s11 = scalar_lea.hbm %s785_s6, 128 }
  0x17   : > { %p577_p3 = scmp.ne.s32.totalorder %s785_s6, %s576_s11  ;;  %p578_p5 = pneg %p791_p0 }
  0x18   : > { %s581_s21 = scalar_lea.hbm %s902_s0, 256  ;;  %p582_p4 = scmp.lt.u32.totalorder %s785_s6, %s902_s0 }
  0x19   : > { %p579_p6 = pnand %p578_p5, %p577_p3  ;;  %p583_p10 = scmp.lt.u32.totalorder %s581_s21, %s576_s11 }
  0x1a   : > { %p585_p12 = scmp.lt.u32.totalorder %s576_s11, %s785_s6 }
  0x1b   : > { %p580_p7 = pneg %p579_p6  ;;  %p584_p13 = por %p583_p10, %p582_p4 }
  0x1d   : > { %p586_p1 = por %p585_p12, %p584_p13 }
  0x1f   : > { %p587_p2 = pnand %p586_p1, %p580_p7 }
  0x21   : > { %590 = shalt.err (!%p587_p2)
}
  0x22   : > { %s591_s28 = scalar_lea.vmem %s787_s8, 128  ;;  %s690_s29 = smov [#allocation2]  }
  0x23   : > { %p592_p3 = scmp.ne.s32.totalorder %s787_s8, %s591_s28  ;;  %s596_s30 = sshll.u32 %s690_s29, 4  ;;  %s597_s30 = int_to_ptr.vmem [resolvable:$false] %s596_s30 }
  0x24   : > { %s598_s4 = scalar_lea.vmem %s597_s30, 256  ;;  %p599_p9 = scmp.lt.s32.totalorder %s787_s8, %s597_s30 }
  0x25   : > { %p594_p6 = pnand %p592_p3, %p578_p5  ;;  %p600_p4 = scmp.lt.s32.totalorder %s598_s4, %s591_s28 }
  0x27   : > { %p595_p11 = pneg %p594_p6  ;;  %p601_p10 = por %p600_p4, %p599_p9 }
  0x29   : > { %p602_p12 = pnand %p601_p10, %p595_p11 }
  0x2b   : > { %605 = shalt.err (!%p602_p12)
}
  0x2c   : > { %506 = dma.hbm_to_vmem [thread:$0]  (!%p791_p0), %s785_s6, 128, %s787_s8, %s154_s10  }
  0x2d   : > { %p912_p1 = scmp.lt.s32.totalorder %s688_s17, 3  ;;  %p913_p2 = scmp.ge.s32.totalorder %s688_s17, 1 }
  0x2f   : > { %p173_p5 = pnand %p913_p2, %p912_p1 }
  0x30   : > { %s827_s5 = sand.u32 (!%p173_p5), 1, %s672_s13  }
  0x31   : > { %176 = sbr.rel (%p173_p5) target bundleno = 218 (0xda), region = 32  ;;  %s490_s7 = sshll.u32 (!%p173_p5), %s827_s5, 3 }
  0x32   : > { %s179_s11 = scalar_lea.sflag (!%p173_p5), [#allocation3], %s827_s5  ;;  %s182_s9 = scalar_lea.vmem (!%p173_p5), [#allocation2], %s490_s7 }
  0x38   : > { %659 = dma.done.wait (%p763_p8), %s179_s11, 128  }
  0x39   : > { %661 = vsyncadd (%p763_p8), %s179_s11, 4294967168  ;;  %v691_v0 = vmov 0   ;;  %v692_v1 = vmov 2   ;;  %v263_v2 = vld [vmem:[%s903_s1] sm:$0xf]  ;;  %v693_v3 = vmov 1   ;;  %v271_v46 = vlaneseq }
  0x3a   : > { %565 = vset.pattern.permute.xlu0 %v691_v0  ;;  %567 = vset.pattern.permute.xlu1 %v692_v1  ;;  %v694_v4 = vmov 3   ;;  %v264_v5 = vld [vmem:[%s904_s2] sm:$0xf]  ;;  %vm211_vm0 = vcmask 1043456   ;;  %s498_s24 = sshll.u32 %s680_s15, 7  ;;  %s204_s19 = scalar_lea.vmem [#allocation5], %s490_s7 }
  0x3b   : > { %267 = vperm.xlu0 %565, %v263_v2   ;;  %318 = vperm.xlu1 %567, %v263_v2   ;;  %v207_v6 = vld [vmem:[%s182_s9] sm:$0xff]  ;;  %v272_v49 = vshrl.u32 %v271_v46, 7  ;;  %s398_s21 = sshll.u32 %s204_s19, 4  ;;  %s853_s28 = scalar_lea.hbm %s905_s3, %s498_s24  ;;  %s855_s21 = int_to_ptr.vmem [resolvable:$true] %s398_s21 }
  0x3c   : > { %v209_v7 = vcombine.high %v207_v6, %v207_v6  ;;  %v212_v8 = vsel %vm211_vm0, %v207_v6, 0.0  ;;  %s382_s29 = scalar_lea.sflag [#allocation4], %s827_s5  ;;  %s606_s30 = scalar_lea.vmem %s855_s21, 128 }
  0x3d   : > { %v213_v10 = vrot.slane %v212_v8, 4  ;;  %v273_v51 = vsub.s32 0, %v272_v49  ;;  %v277_v52 = vsub.s32 4, %v272_v49  ;;  %v297_v54 = vsub.s32 1, %v272_v49  ;;  %p607_p8 = scmp.ne.s32.totalorder %s855_s21, %s606_s30  ;;  %p914_p9 = scmp.ne.s32.totalorder %s909_s25, 0 }
  0x3e   : > { %v219_v9 = vsel %vm211_vm0, %v209_v7, 0.0  ;;  %v301_v55 = vsub.s32 5, %v272_v49  ;;  %v323_v56 = vsub.s32 2, %v272_v49  ;;  %v327_v57 = vsub.s32 6, %v272_v49  ;;  %s695_s15 = smov [#allocation5]  }
  0x3f   : > { %566 = vset.pattern.permute.xlu0 %v693_v3  ;;  %568 = vset.pattern.permute.xlu1 %v694_v4  ;;  %v220_v11 = vrot.slane %v219_v9, 4  ;;  %v214_v12 = vadd.f32 %v213_v10, %v212_v8  ;;  %v349_v58 = vsub.s32 3, %v272_v49  ;;  %v353_v59 = vsub.s32 7, %v272_v49  ;;  %p608_p11 = pnand %p607_p8, %p914_p9  ;;  %s610_s4 = sshll.u32 %s695_s15, 4  ;;  %s611_s4 = int_to_ptr.vmem [resolvable:$false] %s610_s4 }
  0x40   : > { %292 = vperm.xlu0 %566, %v263_v2   ;;  %344 = vperm.xlu1 %568, %v263_v2   ;;  %s612_s7 = scalar_lea.vmem %s611_s4, 256  ;;  %p613_p7 = scmp.lt.s32.totalorder %s855_s21, %s611_s4 }
  0x41   : > { %v221_v13 = vadd.f32 %v220_v11, %v219_v9  ;;  %v215_v14 = vrot.slane %v214_v12, 2  ;;  %p609_p0 = pneg %p608_p11  ;;  %p614_p13 = scmp.lt.s32.totalorder %s612_s7, %s606_s30 }
  0x43   : > { %v222_v15 = vrot.slane %v221_v13, 2  ;;  %v216_v16 = vadd.f32 %v215_v14, %v214_v12  ;;  %p615_p3 = por %p614_p13, %p613_p7 }
  0x44   : > { %569 = vset.pattern.permute.xlu1 %v691_v0  ;;  %570 = vset.pattern.permute.xlu0 %v691_v0 }
  0x45   : > { %371 = vperm.xlu1 %569, %v264_v5   ;;  %v223_v17 = vadd.f32 %v222_v15, %v221_v13  ;;  %v217_v18 = vrot.slane %v216_v16, 1  ;;  %p616_p6 = pnand %p615_p3, %p609_p0 }
  0x47   : > { %v224_v19 = vrot.slane %v223_v17, 1  ;;  %v218_v20 = vadd.f32 %v217_v18, %v216_v16 }
  0x49   : > { %v225_v21 = vadd.f32 %v224_v19, %v223_v17  ;;  %v227_v22 = vmul.f32 0.25, %v218_v20 }
  0x4b   : > { %v228_v23 = vmul.f32 0.25, %v225_v21 }
  0x4d   : > { %v231_v24 = vcombine.low %v227_v22, %v228_v23 }
  0x4f   : > { %v233_v25 = vsub.f32 %v207_v6, %v231_v24 }
  0x51   : > { %v234_v26 = vmul.f32 %v233_v25, %v233_v25 }
  0x53   : > { %v236_v27 = vcombine.high %v234_v26, %v234_v26  ;;  %v238_v28 = vsel %vm211_vm0, %v234_v26, 0.0 }
  0x54   : > { %v239_v30 = vrot.slane %v238_v28, 4 }
  0x55   : > { %v245_v29 = vsel %vm211_vm0, %v236_v27, 0.0 }
  0x56   : > { %v246_v31 = vrot.slane %v245_v29, 4  ;;  %v240_v32 = vadd.f32 %v239_v30, %v238_v28 }
  0x58   : > { %v247_v33 = vadd.f32 %v246_v31, %v245_v29  ;;  %v241_v34 = vrot.slane %v240_v32, 2 }
  0x5a   : > { %v248_v35 = vrot.slane %v247_v33, 2  ;;  %v242_v36 = vadd.f32 %v241_v34, %v240_v32 }
  0x5c   : > { %v249_v37 = vadd.f32 %v248_v35, %v247_v33  ;;  %v243_v38 = vrot.slane %v242_v36, 1 }
  0x5e   : > { %v250_v39 = vrot.slane %v249_v37, 1  ;;  %v244_v40 = vadd.f32 %v243_v38, %v242_v36 }
  0x60   : > { %v251_v41 = vadd.f32 %v250_v39, %v249_v37  ;;  %v252_v42 = vmul.f32 0.25, %v244_v40 }
  0x62   : > { %v253_v43 = vmul.f32 0.25, %v251_v41  ;;  %v254_v44 = vadd.f32 1e-05, %v252_v42 }
  0x64   : > { %v255_v45 = vadd.f32 1e-05, %v253_v43  ;;  %572 = vrsqrt.f32 %v254_v44 }
  0x66   : > { %574 = vrsqrt.f32 %v255_v45 }
  0x6e   : > { %v573_v47 = vpop.eup %572 }
  0x70   : > { %v575_v48 = vpop.eup %574 }
  0x71   : > { %v260_v50 = vcombine.low %v573_v47, %v575_v48 }
  0x73   : > { %v262_v53 = vmul.f32 %v260_v50, %v233_v25 }
  0x75   : > { %v274_v60 = vrot.slane %v262_v53, %v273_v51  ;;  %v278_v61 = vrot.slane %v262_v53, %v277_v52  ;;  %v298_v62 = vrot.slane %v262_v53, %v297_v54  ;;  %v302_v63 = vrot.slane %v262_v53, %v301_v55 }
  0x76   : > { %v324_v0 = vrot.slane %v262_v53, %v323_v56  ;;  %v328_v1 = vrot.slane %v262_v53, %v327_v57  ;;  %v350_v4 = vrot.slane %v262_v53, %v349_v58  ;;  %v354_v5 = vrot.slane %v262_v53, %v353_v59 }
  0x77   : > { %v284_v6 = vrot.slane %v274_v60, %v273_v51  ;;  %v288_v7 = vrot.slane %v278_v61, %v273_v51  ;;  %v308_v8 = vrot.slane %v298_v62, %v297_v54  ;;  %v312_v9 = vrot.slane %v302_v63, %v297_v54 }
  0x78   : > { %v334_v10 = vrot.slane %v324_v0, %v323_v56  ;;  %v338_v11 = vrot.slane %v328_v1, %v323_v56  ;;  %v360_v12 = vrot.slane %v350_v4, %v349_v58  ;;  %v364_v13 = vrot.slane %v354_v5, %v349_v58 }
  0xba   : > { %v268_v2 = vpop.permute.xlu0 %267  ;;  %v319_v3 = vpop.permute.xlu1 %318 }
  0xbb   : > { %v289_v16 = vmul.f32 %v284_v6, %v268_v2  ;;  %v290_v17 = vmul.f32 %v288_v7, %v268_v2  ;;  %v339_v20 = vmul.f32 %v334_v10, %v319_v3  ;;  %v340_v21 = vmul.f32 %v338_v11, %v319_v3 }
  0xbf   : > { %v293_v14 = vpop.permute.xlu0 %292  ;;  %v345_v15 = vpop.permute.xlu1 %344 }
  0xc0   : > { %v313_v18 = vmul.f32 %v308_v8, %v293_v14  ;;  %v314_v19 = vmul.f32 %v312_v9, %v293_v14  ;;  %v365_v24 = vmul.f32 %v360_v12, %v345_v15  ;;  %v366_v25 = vmul.f32 %v364_v13, %v345_v15 }
  0xc2   : > { %v315_v22 = vadd.f32 %v313_v18, %v289_v16  ;;  %v316_v23 = vadd.f32 %v314_v19, %v290_v17 }
  0xc4   : > { %v341_v26 = vadd.f32 %v339_v20, %v315_v22  ;;  %v342_v27 = vadd.f32 %v340_v21, %v316_v23  ;;  %v372_v28 = vpop.permute.xlu1 %371 }
  0xc6   : > { %v367_v29 = vadd.f32 %v365_v24, %v341_v26  ;;  %v368_v30 = vadd.f32 %v366_v25, %v342_v27 }
  0xc8   : > { %v374_v31 = vadd.f32 %v372_v28, %v367_v29  ;;  %v375_v32 = vadd.f32 %v372_v28, %v368_v30 }
  0xca   : > { %v378_v33 = vcombine.low %v374_v31, %v375_v32 }
  0xcc   : > { %380 = vst [vmem:[%s204_s19] sm:$0xff] %v378_v33 }
  0xcd   : > { %619 = shalt.err (!%p616_p6)
}
  0xce   : > { %s620_s5 = scalar_lea.hbm %s853_s28, 128  ;;  %s624_s6 = scalar_lea.hbm %s905_s3, 256 }
  0xcf   : > { %p621_p4 = scmp.ne.s32.totalorder %s853_s28, %s620_s5  ;;  %p625_p1 = scmp.lt.u32.totalorder %s853_s28, %s905_s3 }
  0xd0   : > { %p626_p2 = scmp.lt.u32.totalorder %s624_s6, %s620_s5  ;;  %p628_p8 = scmp.lt.u32.totalorder %s620_s5, %s853_s28 }
  0xd1   : > { %p622_p10 = pnand %p621_p4, %p914_p9 }
  0xd2   : > { %p627_p5 = por %p626_p2, %p625_p1 }
  0xd3   : > { %p623_p12 = pneg %p622_p10 }
  0xd4   : > { %p629_p11 = por %p628_p8, %p627_p5 }
  0xd6   : > { %p630_p0 = pnand %p629_p11, %p623_p12 }
  0xd8   : > { %633 = shalt.err (!%p630_p0)
}
  0xd9   : > { %501 = dma.vmem_to_hbm [thread:$0]  (%p914_p9), %s855_s21, 128, %s853_s28, %s382_s29  }
  0xda PF: > { %s410_s18 = sand.u32 1, %s668_s12   ;;  %p915_p7 = scmp.ne.s32.totalorder %s910_s27, 0 }
  0xdb   : > { %p916_p13 = scmp.ge.s32.totalorder %s688_s17, 2  ;;  %s411_s24 = scalar_lea.sflag [#allocation4], %s410_s18 }
  0xdd   : > { %p508_p3 = pnand %p916_p13, %p915_p7 }
  0xdf   : > { %663 = dma.done.wait (!%p508_p3), %s411_s24, 128  }
  0xe0   : > { %665 = vsyncadd (!%p508_p3), %s411_s24, 4294967168  ;;  %s19_s17 = sadd.s32 1, %s688_s17   ;;  %s917_s12 = smov %s672_s13 }
  0xe1   : > { %p16_p6 = scmp.ge.s32.totalorder %s19_s17, 4   ;;  %s918_s13 = smov %s676_s14 }
  0xe2   : > { %s919_s14 = smov %s772_s26  ;;  %s920_s15 = smov %s684_s16 }
  0xe3   : > { %s921_s16 = smov %s923_s20  ;;  %18 = sbr.rel (!%p16_p6) target bundleno = 6 (0x6), region = 77 }
  0xea   :  { %416 = vsyncpa [#allocation3], 1 }
  0xeb   :  { %418 = vsyncpa [#allocation3 + $0x1], 1 }
  0xec   :  { %419 = vsyncpa [#allocation4], 1 }
  0xed   :  { %421 = vsyncpa [#allocation4 + $0x1], 1 }

</bundles_post_ra>
